<compile_context>
chip_gen: v5e
topology: v5e:2x2
jax: 0.10.0
libtpu: 0.0.40
codegen_flags: <defaults>
</compile_context>

<pallas_src>
import functools

import jax
import jax.numpy as jnp
from jax.experimental import pallas as pl
from jax.experimental.pallas import tpu as pltpu

# ----------------------------- configuration -------------------------------
HIDDEN = 768          # BERT hidden size (fixed by linear1: 768 -> 128)
OUT_DIM = 128
N_HEADS = 12
HEAD_DIM = HIDDEN // N_HEADS
N_LAYERS = 2          # small synthetic stand-in for the 12-layer BERT
INTERMEDIATE = 512
VOCAB = 100
MAX_POS = 16

DROPOUT_P = 0.05      # module default dropout=0.05
SCALE_NOISE = 0.0     # module default scale_noise=0
HIDDEN_STATE_TO_TAKE = -1
TRAINING = True       # torch nn.Module defaults to train mode -> dropout active
MAX_TILE_B = 512      # rows per grid step (512-row tiles ~ HBM roofline)


# ----------------------------- Pallas kernel -------------------------------
def head_kernel(*refs, use_dropout):
    # use_dropout = True : refs = (x_ref, m_ref, w_ref, b_ref, o_ref)
    # use_dropout = False: refs = (x_ref,        w_ref, b_ref, o_ref)
    #   x_ref: VMEM [tile_b, 768] bf16  -- CLS hidden rows (zero-padded batch)
    #   m_ref: VMEM [tile_b, 768] bf16  -- 0/1 dropout keep mask
    #   w_ref: VMEM [768, 128]    bf16  -- linear1 weight (1/(1-p) pre-folded)
    #   b_ref: VMEM [1, 128]      f32   -- linear1 bias
    #   o_ref: VMEM [tile_b, 128] f32   -- L2-normalized embedding
    if use_dropout:
        x_ref, m_ref, w_ref, b_ref, o_ref = refs
    else:
        x_ref, w_ref, b_ref, o_ref = refs

    x = jnp.maximum(x_ref[...], 0)                         # ReLU (bf16)
    if use_dropout:
        x = x * m_ref[...]                                 # 0/1 keep mask (bf16, exact)

    # bf16 operands -> single-pass MXU; f32 accumulation.
    y = jnp.dot(x, w_ref[...], preferred_element_type=jnp.float32)
    y = y + b_ref[...]

    # TODO(synk): scale_noise != 0 would add randn * scale here; the module
    # default scale_noise = 0 makes the term exactly zero, so it is elided.

    nrm_sq = jnp.sum(y * y, axis=-1, keepdims=True)        # L2 normalize
    o_ref[...] = y * jax.lax.rsqrt(nrm_sq + 1e-12)


def text_style_head(x_bf16, w, b, *, dropout_key):
    """x_bf16: [B,768] bf16 CLS rows; w: [768,128] f32; b: [128] f32."""
    B = x_bf16.shape[0]
    use_dropout = TRAINING and DROPOUT_P > 0.0

    # Pad batch (sublane dim) to a multiple of 8, then to a multiple of the
    # grid tile so every block is full and every vreg access is unmasked.
    tile_b = min(MAX_TILE_B, max(8, ((B + 7) // 8) * 8))
    Bp = ((B + tile_b - 1) // tile_b) * tile_b
    if Bp != B:
        x_bf16 = jnp.pad(x_bf16, ((0, Bp - B), (0, 0)))

    # Fold the dropout 1/(1-p) rescale into the bf16 weight (keeps the wide
    # [Bp,768] tensor free of the scalar multiply).
    scale = 1.0 / (1.0 - DROPOUT_P) if use_dropout else 1.0
    w_bf16 = (w.astype(jnp.float32) * scale).astype(jnp.bfloat16)
    b2 = b.reshape(1, OUT_DIM).astype(jnp.float32)

    grid = (Bp // tile_b,)
    in_specs = [pl.BlockSpec((tile_b, HIDDEN), lambda i: (i, 0))]   # x
    args = [x_bf16]
    if use_dropout:
        keep = jax.random.bernoulli(dropout_key, 1.0 - DROPOUT_P, (Bp, HIDDEN))
        args.append(keep.astype(jnp.bfloat16))
        in_specs.append(pl.BlockSpec((tile_b, HIDDEN), lambda i: (i, 0)))
    in_specs += [
        pl.BlockSpec((HIDDEN, OUT_DIM), lambda i: (0, 0)),          # weight (resident)
        pl.BlockSpec((1, OUT_DIM), lambda i: (0, 0)),               # bias   (resident)
    ]
    args += [w_bf16, b2]

    # Megacore sharding across the batch grid on TPU only; keep the fallback
    # (non-TPU sandbox) lowering path free of Mosaic-specific params.
    compiler_params = None
    if jax.default_backend() == "tpu":
        compiler_params = pltpu.CompilerParams(dimension_semantics=("parallel",))

    out = pl.pallas_call(
        functools.partial(head_kernel, use_dropout=use_dropout),
        out_shape=jax.ShapeDtypeStruct((Bp, OUT_DIM), jnp.float32),
        grid=grid,
        in_specs=in_specs,
        out_specs=pl.BlockSpec((tile_b, OUT_DIM), lambda i: (i, 0)),
        compiler_params=compiler_params,
    )(*args)
    return out[:B]


# ------------------- synthetic BERT encoder (plain JAX glue) ----------------
# TODO(synk): pretrained HuggingFace 'bert-base-cased' weights are not loadable
# here; this is a small deterministic stand-in producing the hidden_states tuple.
def init_params(key):
    keys = iter(jax.random.split(key, 64))

    def w(shape, scale=0.02):
        return (scale * jax.random.normal(next(keys), shape)).astype(jnp.float32)

    params = {
        "word_emb": w((VOCAB, HIDDEN)),
        "pos_emb": w((MAX_POS, HIDDEN)),
        "type_emb": w((2, HIDDEN)),
        "emb_ln_g": jnp.ones((HIDDEN,), jnp.float32),
        "emb_ln_b": jnp.zeros((HIDDEN,), jnp.float32),
        "layers": [],
        "linear1_w": w((HIDDEN, OUT_DIM)),                 # f32; cast to bf16 at call
        "linear1_b": jnp.zeros((OUT_DIM,), jnp.float32),
    }
    for _ in range(N_LAYERS):
        params["layers"].append({
            "q_w": w((HIDDEN, HIDDEN)), "q_b": jnp.zeros((HIDDEN,), jnp.float32),
            "k_w": w((HIDDEN, HIDDEN)), "k_b": jnp.zeros((HIDDEN,), jnp.float32),
            "v_w": w((HIDDEN, HIDDEN)), "v_b": jnp.zeros((HIDDEN,), jnp.float32),
            "o_w": w((HIDDEN, HIDDEN)), "o_b": jnp.zeros((HIDDEN,), jnp.float32),
            "attn_ln_g": jnp.ones((HIDDEN,), jnp.float32),
            "attn_ln_b": jnp.zeros((HIDDEN,), jnp.float32),
            "ffn_in_w": w((HIDDEN, INTERMEDIATE)),
            "ffn_in_b": jnp.zeros((INTERMEDIATE,), jnp.float32),
            "ffn_out_w": w((INTERMEDIATE, HIDDEN)),
            "ffn_out_b": jnp.zeros((HIDDEN,), jnp.float32),
            "ffn_ln_g": jnp.ones((HIDDEN,), jnp.float32),
            "ffn_ln_b": jnp.zeros((HIDDEN,), jnp.float32),
        })
    return params


def layer_norm(x, g, b, eps=1e-12):
    mu = jnp.mean(x, axis=-1, keepdims=True)
    var = jnp.mean(jnp.square(x - mu), axis=-1, keepdims=True)
    return (x - mu) / jnp.sqrt(var + eps) * g + b


def bert_encoder(params, input_ids, attention_mask):
    # Returns the hidden_states tuple: (embedding_output, layer_1, ..., layer_N)
    B, S = input_ids.shape
    pos = jnp.arange(S)
    h = (params["word_emb"][input_ids]
         + params["pos_emb"][pos][None, :, :]
         + params["type_emb"][0][None, None, :])
    h = layer_norm(h, params["emb_ln_g"], params["emb_ln_b"])
    hidden_states = [h]

    ext_mask = (1.0 - attention_mask.astype(jnp.float32))[:, None, None, :] * -1e4
    scale = 1.0 / jnp.sqrt(jnp.float32(HEAD_DIM))

    for lp in params["layers"]:
        def split_heads(t):
            return t.reshape(B, S, N_HEADS, HEAD_DIM).transpose(0, 2, 1, 3)

        q = split_heads(h @ lp["q_w"] + lp["q_b"])
        k = split_heads(h @ lp["k_w"] + lp["k_b"])
        v = split_heads(h @ lp["v_w"] + lp["v_b"])

        scores = jnp.einsum("bhqd,bhkd->bhqk", q, k) * scale + ext_mask
        probs = jax.nn.softmax(scores, axis=-1)
        ctx = jnp.einsum("bhqk,bhkd->bhqd", probs, v)
        ctx = ctx.transpose(0, 2, 1, 3).reshape(B, S, HIDDEN)

        attn_out = ctx @ lp["o_w"] + lp["o_b"]
        h = layer_norm(h + attn_out, lp["attn_ln_g"], lp["attn_ln_b"])

        ff = jax.nn.gelu(h @ lp["ffn_in_w"] + lp["ffn_in_b"])
        ff = ff @ lp["ffn_out_w"] + lp["ffn_out_b"]
        h = layer_norm(h + ff, lp["ffn_ln_g"], lp["ffn_ln_b"])

        hidden_states.append(h)
    return tuple(hidden_states)


# ------------------------- full module forward ------------------------------
def text_style_embed_forward(params, input_ids, mask, dropout_key):
    hidden_states = bert_encoder(params, input_ids, mask)
    attention_hidden_states = hidden_states[1:]
    x = attention_hidden_states[HIDDEN_STATE_TO_TAKE][:, 0, :]   # CLS token, [B, 768]

    # bf16 halves the x bytes DMA'd into the kernel; ReLU in-kernel commutes
    # exactly with the downcast, and the MXU operand is bf16 either way.
    return text_style_head(x.astype(jnp.bfloat16),
                           params["linear1_w"], params["linear1_b"],
                           dropout_key=dropout_key)


if __name__ == "__main__":
    key = jax.random.PRNGKey(0)
    k_params, k_ids, k_drop = jax.random.split(key, 3)

    params = init_params(k_params)

    B, S = 2, 8
    input_ids = jax.random.randint(k_ids, (B, S), 0, VOCAB, dtype=jnp.int32)
    mask = jnp.ones((B, S), dtype=jnp.int32)

    out = text_style_embed_forward(params, input_ids, mask, dropout_key=k_drop)
    out = jax.block_until_ready(out)

    assert out.shape == (B, OUT_DIM), out.shape
    norms = jnp.linalg.norm(out, axis=-1)
    assert jnp.allclose(norms, 1.0, atol=1e-3), norms
    assert bool(jnp.all(jnp.isfinite(out)))
    print("KERNEL_OK")
</pallas_src>

<mosaic_0001>
module attributes {stable_mosaic.version = 11 : i64} {
  func.func @head_kernel(%arg0: i32, %arg1: memref<8x768xbf16, #tpu.memory_space<vmem>>, %arg2: memref<8x768xbf16, #tpu.memory_space<vmem>>, %arg3: memref<768x128xbf16, #tpu.memory_space<vmem>>, %arg4: memref<1x128xf32, #tpu.memory_space<vmem>>, %arg5: memref<8x128xf32, #tpu.memory_space<vmem>>) attributes {dimension_semantics = [#tpu.dimension_semantics<arbitrary>], iteration_bounds = array<i64: 1>, scalar_prefetch = 0 : i64, scratch_operands = 0 : i64, tpu.core_type = #tpu.core_type<tc>, window_params = [{transform_indices = @transform_0, window_bounds = array<i64: 8, 768>}, {transform_indices = @transform_1, window_bounds = array<i64: 8, 768>}, {pipeline_mode = #tpu.pipeline_mode<synchronous>, transform_indices = @transform_2, window_bounds = array<i64: 768, 128>}, {pipeline_mode = #tpu.pipeline_mode<synchronous>, transform_indices = @transform_3, window_bounds = array<i64: 1, 128>}, {transform_indices = @transform_4, window_bounds = array<i64: 8, 128>}]} {
    %c0 = arith.constant 0 : index
    %c0_0 = arith.constant 0 : index
    %0 = vector.load %arg1[%c0, %c0_0] : memref<8x768xbf16, #tpu.memory_space<vmem>>, vector<8x768xbf16>
    %cst = arith.constant 0.000000e+00 : bf16
    %1 = vector.broadcast %cst : bf16 to vector<8x768xbf16>
    %2 = arith.maximumf %0, %1 : vector<8x768xbf16>
    %c0_1 = arith.constant 0 : index
    %c0_2 = arith.constant 0 : index
    %3 = vector.load %arg2[%c0_1, %c0_2] : memref<8x768xbf16, #tpu.memory_space<vmem>>, vector<8x768xbf16>
    %4 = arith.mulf %2, %3 : vector<8x768xbf16>
    %c0_3 = arith.constant 0 : index
    %c0_4 = arith.constant 0 : index
    %5 = vector.load %arg3[%c0_3, %c0_4] : memref<768x128xbf16, #tpu.memory_space<vmem>>, vector<768x128xbf16>
    %cst_5 = arith.constant dense<0.000000e+00> : vector<8x128xf32>
    %6 = tpu.matmul %4, %5, %cst_5 {dimension_numbers = #tpu.dot_dimension_numbers<[1], [0], [0], [1], [0, 0, 1, 1], [], []>} : vector<8x768xbf16>, vector<768x128xbf16>, vector<8x128xf32> -> vector<8x128xf32>
    %c0_6 = arith.constant 0 : index
    %c0_7 = arith.constant 0 : index
    %7 = vector.load %arg4[%c0_6, %c0_7] : memref<1x128xf32, #tpu.memory_space<vmem>>, vector<1x128xf32>
    %8 = vector.broadcast %7 : vector<1x128xf32> to vector<8x128xf32>
    %9 = arith.addf %6, %8 : vector<8x128xf32>
    %10 = arith.mulf %9, %9 : vector<8x128xf32>
    %cst_8 = arith.constant dense<0.000000e+00> : vector<8xf32>
    %11 = vector.multi_reduction <add>, %10, %cst_8 [1] : vector<8x128xf32> to vector<8xf32>
    %12 = vector.shape_cast %11 : vector<8xf32> to vector<8x1xf32>
    %cst_9 = arith.constant 9.99999996E-13 : f32
    %13 = vector.broadcast %cst_9 : f32 to vector<8x1xf32>
    %14 = arith.addf %12, %13 : vector<8x1xf32>
    %15 = math.rsqrt %14 : vector<8x1xf32>
    %16 = vector.broadcast %15 : vector<8x1xf32> to vector<8x128xf32>
    %17 = arith.mulf %9, %16 : vector<8x128xf32>
    %c0_10 = arith.constant 0 : index
    %c0_11 = arith.constant 0 : index
    %18 = vector.load %arg5[%c0_10, %c0_11] : memref<8x128xf32, #tpu.memory_space<vmem>>, vector<8x128xf32>
    tpu.vector_store %arg5[%c0_10, %c0_11], %17 {strides = array<i32>} : memref<8x128xf32, #tpu.memory_space<vmem>>, vector<8x128xf32>,
    return
  }
  func.func @transform_0(%arg0: i32) -> (i32, i32) {
    %c0_i32 = arith.constant 0 : i32
    %c0_i32_0 = arith.constant 0 : i32
    return %arg0, %c0_i32 : i32, i32
  }
  func.func @transform_1(%arg0: i32) -> (i32, i32) {
    %c0_i32 = arith.constant 0 : i32
    %c0_i32_0 = arith.constant 0 : i32
    return %arg0, %c0_i32 : i32, i32
  }
  func.func @transform_2(%arg0: i32) -> (i32, i32) {
    %c0_i32 = arith.constant 0 : i32
    %c0_i32_0 = arith.constant 0 : i32
    %c0_i32_1 = arith.constant 0 : i32
    return %c0_i32, %c0_i32_0 : i32, i32
  }
  func.func @transform_3(%arg0: i32) -> (i32, i32) {
    %c0_i32 = arith.constant 0 : i32
    %c0_i32_0 = arith.constant 0 : i32
    %c0_i32_1 = arith.constant 0 : i32
    return %c0_i32, %c0_i32_0 : i32, i32
  }
  func.func @transform_4(%arg0: i32) -> (i32, i32) {
    %c0_i32 = arith.constant 0 : i32
    %c0_i32_0 = arith.constant 0 : i32
    return %arg0, %c0_i32 : i32, i32
  }
}

</mosaic_0001>

<bundles_post_ra>
// kernel: tpu_custom_call.1
= control target key start
LH: loop header
LB: loop body
LE: loop exit
PB: predicated region body
PF: predicated region fallthrough
CT: control target
= control target key end

     0   :  { %9 = vsyncpa [#allocation3], 0  ;;  %s1003_s0 = inlined_call_operand.hbm [shape: bf16[8,768], index: 0, kind: input, shape index: {}]   ;;  %s1004_s1 = inlined_call_operand.hbm [shape: bf16[8,768], index: 1, kind: input, shape index: {}]   ;;  %s1005_s2 = inlined_call_operand.hbm [shape: bf16[768,128], index: 2, kind: input, shape index: {}]   ;;  %s1006_s3 = inlined_call_operand.vmem [shape: f32[1,128], index: 3, kind: input, shape index: {}]   ;;  %s1007_s4 = inlined_call_operand.hbm [shape: f32[8,128], index: 4, kind: output, shape index: {}]  }
   0x1   :  { %10 = vsyncpa [#allocation6], 0  ;;  %s28_s17 = sshll.u32 %s1004_s1, 4  ;;  %s29_s17 = int_to_ptr.hbm [resolvable:$true] %s28_s17 }
   0x2   :  { %11 = vsyncpa [#allocation4], 0  ;;  %s957_s18 = smov [#allocation5]   ;;  %s17_s22 = sshll.u32 %s1003_s0, 4  ;;  %s18_s22 = int_to_ptr.hbm [resolvable:$true] %s17_s22 }
   0x3   :  { %s30_s19 = sshll.u32 %s957_s18, 4  ;;  %s958_s23 = smov [#allocation2]   ;;  %s31_s19 = int_to_ptr.vmem [resolvable:$true] %s30_s19 }
   0x4   :  { %33 = dma.hbm_to_vmem [thread:$0]  %s29_s17, 384, %s31_s19, [#allocation6]  }
   0x5   :  { %s19_s24 = sshll.u32 %s958_s23, 4  ;;  %s38_s27 = sshll.u32 %s1005_s2, 4  ;;  %s20_s24 = int_to_ptr.vmem [resolvable:$true] %s19_s24  ;;  %s39_s27 = int_to_ptr.hbm [resolvable:$true] %s38_s27 }
   0x6   :  { %22 = dma.hbm_to_vmem [thread:$0]  %s18_s22, 384, %s20_s24, [#allocation3]  }
   0x7   :  { %s959_s1 = smov [#allocation7]   ;;  %s960_s29 = smov 64  }
   0x8   :  { %s40_s28 = sshll.u32 %s959_s1, 4  ;;  %s961_s30 = smov 4   ;;  %s41_s28 = int_to_ptr.vmem [resolvable:$true] %s40_s28 }
   0x9   :  { %46 = dma.hbm_to_vmem [thread:$0]  %s39_s27, 6144, %s41_s28, [#allocation6], %s960_s29, %s960_s29, %s961_s30  }
   0xa   :  { %951 = dma.done.wait [#allocation3], 384  }
   0xb   :  { %952 = vsyncadd [#allocation3], 4294966912 }
   0xc   :  { %953 = dma.done.wait [#allocation6], 6528  }
   0xd   :  { %954 = vsyncadd [#allocation6], 4294960768  ;;  %v805_v0 = vld [vmem:[#allocation7 + $0x38] sm:$0xff]  ;;  %v804_v2 = vld [vmem:[#allocation7 + $0x30] sm:$0xff]  ;;  %s595_s8 = sshll.u32 %s1007_s4, 4  ;;  %s596_s8 = int_to_ptr.hbm [resolvable:$true] %s595_s8 }
   0xe   :  { %v813_v1 = vld [vmem:[#allocation7 + $0x78] sm:$0xff]  ;;  %494 = vmatpush.bf16.msra.mxu0 %v805_v0  ;;  %v812_v3 = vld [vmem:[#allocation7 + $0x70] sm:$0xff]  ;;  %v803_v8 = vld [vmem:[#allocation7 + $0x28] sm:$0xff] }
   0xf   :  { %507 = vmatpush.bf16.msra.mxu1 %v813_v1  ;;  %v821_v4 = vld [vmem:[#allocation7 + $0xb8] sm:$0xff]  ;;  %v820_v6 = vld [vmem:[#allocation7 + $0xb0] sm:$0xff]  ;;  %v811_v9 = vld [vmem:[#allocation7 + $0x68] sm:$0xff] }
  0x10   :  { %v829_v5 = vld [vmem:[#allocation7 + $0xf8] sm:$0xff]  ;;  %520 = vmatpush.bf16.msra.mxu2 %v821_v4  ;;  %v828_v7 = vld [vmem:[#allocation7 + $0xf0] sm:$0xff]  ;;  %v819_v10 = vld [vmem:[#allocation7 + $0xa8] sm:$0xff] }
  0x11   :  { %533 = vmatpush.bf16.msra.mxu3 %v829_v5  ;;  %v827_v11 = vld [vmem:[#allocation7 + $0xe8] sm:$0xff]  ;;  %v802_v12 = vld [vmem:[#allocation7 + $0x20] sm:$0xff]  ;;  %v61_v14 = vld [vmem:[#allocation2] sm:$0xff] }
  0x12   :  { %495 = vmatpush.bf16.msra.mxu0 %v804_v2  ;;  %v810_v13 = vld [vmem:[#allocation7 + $0x60] sm:$0xff]  ;;  %v64_v16 = vunpack.c.l.bf16 %v61_v14  ;;  %v65_v17 = vunpack.c.h.bf16 %v61_v14  ;;  %v801_v19 = vld [vmem:[#allocation7 + $0x18] sm:$0xff]  ;;  %v800_v31 = vld [vmem:[#allocation7 + $0x10] sm:$0xff] }
  0x13   :  { %508 = vmatpush.bf16.msra.mxu1 %v812_v3  ;;  %v818_v15 = vld [vmem:[#allocation7 + $0xa0] sm:$0xff]  ;;  %v809_v20 = vld [vmem:[#allocation7 + $0x58] sm:$0xff]  ;;  %v808_v32 = vld [vmem:[#allocation7 + $0x50] sm:$0xff] }
  0x14   :  { %521 = vmatpush.bf16.msra.mxu2 %v820_v6  ;;  %v826_v18 = vld [vmem:[#allocation7 + $0xe0] sm:$0xff]  ;;  %v70_v21 = vmax.f32 %v64_v16, 0.0  ;;  %v71_v22 = vmax.f32 %v65_v17, 0.0  ;;  %v62_v23 = vld [vmem:[#allocation2 + $0x8] sm:$0xff]  ;;  %v79_v33 = vld [vmem:[#allocation5] sm:$0xff] }
  0x15   :  { %534 = vmatpush.bf16.msra.mxu3 %v828_v7  ;;  %v66_v24 = vunpack.c.l.bf16 %v62_v23  ;;  %v67_v25 = vunpack.c.h.bf16 %v62_v23  ;;  %v817_v26 = vld [vmem:[#allocation7 + $0x98] sm:$0xff]  ;;  %v816_v34 = vld [vmem:[#allocation7 + $0x90] sm:$0xff]  ;;  %v88_v38 = vunpack.c.l.bf16 %v79_v33  ;;  %v89_v40 = vunpack.c.h.bf16 %v79_v33  ;;  %v799_v42 = vld [vmem:[#allocation7 + $0x8] sm:$0xff] }
  0x16   :  { %496 = vmatpush.bf16.msra.mxu0 %v803_v8  ;;  %v825_v27 = vld [vmem:[#allocation7 + $0xd8] sm:$0xff]  ;;  %v76_v28 = vpack.c.bf16 %v71_v22, %v70_v21  ;;  %v824_v36 = vld [vmem:[#allocation7 + $0xd0] sm:$0xff]  ;;  %v807_v43 = vld [vmem:[#allocation7 + $0x48] sm:$0xff] }
  0x17   :  { %509 = vmatpush.bf16.msra.mxu1 %v811_v9  ;;  %v72_v29 = vmax.f32 %v66_v24, 0.0  ;;  %v73_v30 = vmax.f32 %v67_v25, 0.0  ;;  %v80_v41 = vld [vmem:[#allocation5 + $0x8] sm:$0xff]  ;;  %v815_v44 = vld [vmem:[#allocation7 + $0x88] sm:$0xff]  ;;  %v798_v52 = vld [vmem:[#allocation7] sm:$0xff] }
  0x18   :  { %522 = vmatpush.bf16.msra.mxu2 %v819_v10  ;;  %v82_v37 = vunpack.c.l.bf16 %v76_v28  ;;  %v83_v39 = vunpack.c.h.bf16 %v76_v28  ;;  %v90_v46 = vunpack.c.l.bf16 %v80_v41  ;;  %v823_v48 = vld [vmem:[#allocation7 + $0xc8] sm:$0xff]  ;;  %v91_v51 = vunpack.c.h.bf16 %v80_v41  ;;  %v806_v53 = vld [vmem:[#allocation7 + $0x40] sm:$0xff]  ;;  %v837_v54 = vld [vmem:[#allocation7 + $0x138] sm:$0xff] }
  0x19   :  { %535 = vmatpush.bf16.msra.mxu3 %v827_v11  ;;  %v77_v35 = vpack.c.bf16 %v73_v30, %v72_v29  ;;  %v845_v55 = vld [vmem:[#allocation7 + $0x178] sm:$0xff]  ;;  %v814_v56 = vld [vmem:[#allocation7 + $0x80] sm:$0xff]  ;;  %v836_v62 = vld [vmem:[#allocation7 + $0x130] sm:$0xff] }
  0x1a   :  { %497 = vmatpush.bf16.msra.mxu0 %v802_v12  ;;  %v94_v47 = vmul.f32 %v88_v38, %v82_v37  ;;  %v95_v49 = vmul.f32 %v89_v40, %v83_v39  ;;  %v822_v61 = vld [vmem:[#allocation7 + $0xc0] sm:$0xff]  ;;  %v844_v63 = vld [vmem:[#allocation7 + $0x170] sm:$0xff]  ;;  %v835_v2 = vld [vmem:[#allocation7 + $0x128] sm:$0xff] }
  0x1b   :  { %510 = vmatpush.bf16.msra.mxu1 %v810_v13  ;;  %v84_v45 = vunpack.c.l.bf16 %v77_v35  ;;  %v85_v50 = vunpack.c.h.bf16 %v77_v35  ;;  %v843_v3 = vld [vmem:[#allocation7 + $0x168] sm:$0xff]  ;;  %v63_v4 = vld [vmem:[#allocation2 + $0x10] sm:$0xff]  ;;  %v833_v11 = vld [vmem:[#allocation7 + $0x118] sm:$0xff] }
  0x1c   :  { %523 = vmatpush.bf16.msra.mxu2 %v818_v15  ;;  %v100_v58 = vpack.c.bf16 %v94_v47, %v94_v47  ;;  %v101_v59 = vpack.c.bf16 %v95_v49, %v95_v49  ;;  %v68_v5 = vunpack.c.l.bf16 %v63_v4  ;;  %v69_v6 = vunpack.c.h.bf16 %v63_v4  ;;  %v834_v7 = vld [vmem:[#allocation7 + $0x120] sm:$0xff]  ;;  %v841_v12 = vld [vmem:[#allocation7 + $0x158] sm:$0xff]  ;;  %v832_v14 = vld [vmem:[#allocation7 + $0x110] sm:$0xff] }
  0x1d   :  { %536 = vmatpush.bf16.msra.mxu3 %v826_v18  ;;  %v96_v57 = vmul.f32 %v90_v46, %v84_v45  ;;  %v97_v60 = vmul.f32 %v91_v51, %v85_v50  ;;  %v842_v8 = vld [vmem:[#allocation7 + $0x160] sm:$0xff]  ;;  %v840_v15 = vld [vmem:[#allocation7 + $0x150] sm:$0xff]  ;;  %v81_v16 = vld [vmem:[#allocation5 + $0x10] sm:$0xff] }
  0x1e   :  { %498 = vmatpush.bf16.msra.mxu0 %v801_v19  ;;  %v74_v9 = vmax.f32 %v68_v5, 0.0  ;;  %v75_v10 = vmax.f32 %v69_v6, 0.0  ;;  %v92_v18 = vunpack.c.l.bf16 %v81_v16  ;;  %v831_v21 = vld [vmem:[#allocation7 + $0x108] sm:$0xff]  ;;  %v830_v25 = vld [vmem:[#allocation7 + $0x100] sm:$0xff]  ;;  %v852_v35 = vld [vmem:[%s1006_s3] ss:$0 sm:$0xff] }
  0x1f   :  { %511 = vmatpush.bf16.msra.mxu1 %v809_v20  ;;  %v102_v0 = vpack.c.bf16 %v96_v57, %v96_v57  ;;  %v103_v1 = vpack.c.bf16 %v97_v60, %v97_v60  ;;  %v93_v20 = vunpack.c.h.bf16 %v81_v16  ;;  %v839_v22 = vld [vmem:[#allocation7 + $0x148] sm:$0xff]  ;;  %s962_s3 = smov [#allocation8]  }
  0x20   :  { %524 = vmatpush.bf16.msra.mxu2 %v817_v26  ;;  %v78_v13 = vpack.c.bf16 %v75_v10, %v74_v9  ;;  %v838_v26 = vld [vmem:[#allocation7 + $0x140] sm:$0xff]  ;;  %s593_s5 = sshll.u32 %s962_s3, 4  ;;  %s594_s5 = int_to_ptr.vmem [resolvable:$true] %s593_s5 }
  0x21   :  { %537 = vmatpush.bf16.msra.mxu3 %v825_v27 }
  0x22   :  { %499 = vmatpush.bf16.msra.mxu0 %v800_v31  ;;  %v86_v17 = vunpack.c.l.bf16 %v78_v13  ;;  %v87_v19 = vunpack.c.h.bf16 %v78_v13 }
  0x23   :  { %512 = vmatpush.bf16.msra.mxu1 %v808_v32 }
  0x24   :  { %525 = vmatpush.bf16.msra.mxu2 %v816_v34  ;;  %v98_v23 = vmul.f32 %v92_v18, %v86_v17  ;;  %v99_v24 = vmul.f32 %v93_v20, %v87_v19 }
  0x25   :  { %538 = vmatpush.bf16.msra.mxu3 %v824_v36 }
  0x26   :  { %500 = vmatpush.bf16.msra.mxu0 %v799_v42  ;;  %v104_v27 = vpack.c.bf16 %v98_v23, %v98_v23  ;;  %v105_v28 = vpack.c.bf16 %v99_v24, %v99_v24 }
  0x27   :  { %513 = vmatpush.bf16.msra.mxu1 %v807_v43 }
  0x28   :  { %526 = vmatpush.bf16.msra.mxu2 %v815_v44 }
  0x29   :  { %539 = vmatpush.bf16.msra.mxu3 %v823_v48 }
  0x2a   :  { %501 = vmatpush.bf16.msra.mxu0 %v798_v52 }
  0x2b   :  { %514 = vmatpush.bf16.msra.mxu1 %v806_v53 }
  0x2c   :  { %527 = vmatpush.bf16.msra.mxu2 %v814_v56 }
  0x2d   :  { %502 = vmatmul.bf16.vlgmr.msra.gmra.mxu0 %v100_v58  ;;  %540 = vmatpush.bf16.msra.mxu3 %v822_v61 }
  0x2e   :  { %546 = vmatpush.bf16.msrb.mxu0 %v837_v54  ;;  %515 = vmatmul.bf16.vlgmr.msra.gmra.mxu1 %v101_v59 }
  0x2f   :  { %559 = vmatpush.bf16.msrb.mxu1 %v845_v55  ;;  %528 = vmatmul.bf16.vlgmr.msra.gmra.mxu2 %v102_v0 }
  0x30   :  { %541 = vmatmul.bf16.vlgmr.msra.gmra.mxu3 %v103_v1 }
  0x32   :  { %547 = vmatpush.bf16.msrb.mxu0 %v836_v62 }
  0x33   :  { %560 = vmatpush.bf16.msrb.mxu1 %v844_v63 }
  0x36   :  { %548 = vmatpush.bf16.msrb.mxu0 %v835_v2 }
  0x37   :  { %561 = vmatpush.bf16.msrb.mxu1 %v843_v3 }
  0x3a   :  { %549 = vmatpush.bf16.msrb.mxu0 %v834_v7 }
  0x3b   :  { %562 = vmatpush.bf16.msrb.mxu1 %v842_v8 }
  0x3e   :  { %550 = vmatpush.bf16.msrb.mxu0 %v833_v11 }
  0x3f   :  { %563 = vmatpush.bf16.msrb.mxu1 %v841_v12 }
  0x42   :  { %551 = vmatpush.bf16.msrb.mxu0 %v832_v14 }
  0x43   :  { %564 = vmatpush.bf16.msrb.mxu1 %v840_v15 }
  0x46   :  { %552 = vmatpush.bf16.msrb.mxu0 %v831_v21 }
  0x47   :  { %565 = vmatpush.bf16.msrb.mxu1 %v839_v22 }
  0x4a   :  { %553 = vmatpush.bf16.msrb.mxu0 %v830_v25 }
  0x4b   :  { %566 = vmatpush.bf16.msrb.mxu1 %v838_v26 }
  0x4d   :  { %554 = vmatmul.bf16.vlgmr.msrb.gmra.mxu0 %v104_v27 }
  0x4e   :  { %567 = vmatmul.bf16.vlgmr.msrb.gmra.mxu1 %v105_v28 }
  0xaa   :  { %v503_v29 = vpop.f32.mrf.mxu0 }
  0xab   :  { %v516_v30 = vpop.f32.mrf.mxu1  ;;  %v504_v36 = vadd.f32 %v852_v35, %v503_v29 }
  0xad   :  { %v517_v39 = vadd.f32 %v516_v30, %v504_v36 }
  0xb2   :  { %v505_v31 = vpop.f32.mrf.mxu0  ;;  %v529_v33 = vpop.f32.mrf.mxu2 }
  0xb3   :  { %v518_v32 = vpop.f32.mrf.mxu1  ;;  %v542_v34 = vpop.f32.mrf.mxu3  ;;  %v530_v40 = vadd.f32 %v529_v33, %v517_v39 }
  0xb5   :  { %v543_v41 = vadd.f32 %v542_v34, %v530_v40 }
  0xba   :  { %v531_v37 = vpop.f32.mrf.mxu2 }
  0xbb   :  { %v544_v38 = vpop.f32.mrf.mxu3 }
  0xca   :  { %v555_v42 = vpop.f32.mrf.mxu0 }
  0xcb   :  { %v568_v43 = vpop.f32.mrf.mxu1  ;;  %v556_v44 = vadd.f32 %v555_v42, %v543_v41 }
  0xcd   :  { %v569_v45 = vadd.f32 %v568_v43, %v556_v44 }
  0xcf   :  { %v572_v46 = vmul.f32 %v569_v45, %v569_v45 }
  0xd1   :  { %573 = vadd.xlane.f32.xlu0 %v572_v46 }
  0xd2   :  { %v557_v47 = vpop.f32.mrf.mxu0 }
  0xd3   :  { %v570_v48 = vpop.f32.mrf.mxu1 }
 0x144   :  { %v574_v49 = vpop.xlane.xlu0 %573 }
 0x145   :  { %v575_v50 = vadd.f32 1e-12, %v574_v49 }
 0x147   :  { %853 = vrsqrt.f32 %v575_v50  ;;  %vm582_vm1 = vweird.f32 %v575_v50 }
 0x14d   :  { %v854_v51 = vpop.eup %853 }
 0x14e   :  { %v577_v52 = vmul.f32 %v854_v51, %v575_v50  ;;  %vm583_vm0 = vweird.f32 %v854_v51 }
 0x14f   :  { %vm584_vm2 = vmor %vm582_vm1, %vm583_vm0 }
 0x150   :  { %v578_v53 = vmul.f32 %v854_v51, %v577_v52 }
 0x152   :  { %v579_v54 = vmul.f32 0.5, %v578_v53 }
 0x154   :  { %v580_v55 = vsub.f32 1.5, %v579_v54 }
 0x156   :  { %v581_v56 = vmul.f32 %v854_v51, %v580_v55 }
 0x158   :  { %v585_v57 = vsel %vm584_vm2, %v854_v51, %v581_v56 }
 0x159   :  { %v586_v58 = vmul.f32 %v585_v57, %v569_v45 }
 0x15b   :  { %587 = vst [vmem:[#allocation8] sm:$0xff] %v586_v58 }
 0x15c   :  { %598 = dma.vmem_to_hbm [thread:$0]  %s594_s5, 128, %s596_s8, [#allocation4]  }
 0x15d   :  { %955 = dma.done.wait [#allocation4], 128  }
 0x15e   :  { %956 = vsyncadd [#allocation4], 4294967168 }
 0x15f   :  { %603 = vsyncpa [#allocation3], 1 }
 0x160   :  { %604 = vsyncpa [#allocation6], 1 }
 0x161   :  { %605 = vsyncpa [#allocation4], 1 }

</bundles_post_ra>
